<compile_context>
chip_gen: v7x
topology: tpu7x:2x2x1
jax: 0.10.0
libtpu: 0.0.40
codegen_flags: <defaults>
</compile_context>

<pallas_src>
import jax
import jax.numpy as jnp
from jax import lax
from jax.experimental import pallas as pl
from jax.experimental.pallas import tpu as pltpu


def _round_up(n, m):
    return ((n + m - 1) // m) * m


# ---------------------------------------------------------------------------
# Fused kernel (one batch tile per grid step)
#   x_ref   : (1, 10*TB, 90) bf16  row-window oh of image b at row oh*TB + b
#   a1_ref  : (90, 256)      bf16  conv1 banded weights, col = partner*128+pw*16+co
#   b1_ref  : (1, 256)       f32   conv1 bias (0 on the pw>=5 pad lanes)
#   a2_ref  : (640, 128)     bf16  conv2 banded weights over the whole pooled map,
#                                  col = s*32 + g*8 + co (g = pool cell, s = window elem)
#   b2_ref  : (1, 128)       f32
#   wf_ref  : (1, 32)        f32   fc weights reordered to lane = g*8 + c
#   bf_ref  : (1, 1)         f32
#   o_ref   : (TB, 1)        f32   logits
#   pool_ref: (TB, 640)      bf16  VMEM scratch, lane = pooled_row*128 + w*16 + ci
# ---------------------------------------------------------------------------
def _disc_kernel(x_ref, a1_ref, b1_ref, a2_ref, b2_ref, wf_ref, bf_ref,
                 o_ref, pool_ref):
    f32 = jnp.float32
    tb = pool_ref.shape[0]

    a1 = a1_ref[...]                                             # (90, 256) bf16
    b1 = b1_ref[...]                                             # (1, 256)  f32

    # ---- conv1 (+bias, +ReLU) fused with the 2x2 / stride-2 max-pool --------
    # One GEMM per pooled-row pair: rows [2ph*tb, (2ph+2)*tb) are the two
    # contributing conv1 row-windows for all tb images (aligned, contiguous).
    for ph in range(5):
        xw = x_ref[0, 2 * ph * tb:(2 * ph + 2) * tb, :]          # (2tb, 90) bf16
        y = jnp.dot(xw, a1, preferred_element_type=f32) + b1     # (2tb, 256) f32
        y = jnp.maximum(y, 0.0)
        rmax = jnp.maximum(y[:tb, :], y[tb:, :])                 # pool over rows
        prow = jnp.maximum(rmax[:, :128], rmax[:, 128:])         # pool over cols
        pool_ref[:, 128 * ph:128 * (ph + 1)] = prow.astype(pool_ref.dtype)

    # ---- conv2 (+bias, +ReLU): all 3x3x8 outputs, duplicated into the four
    # 2x2/stride-1 pooling window positions, in ONE banded GEMM ---------------
    y2 = jnp.dot(pool_ref[...], a2_ref[...],
                 preferred_element_type=f32) + b2_ref[...]        # (tb, 128) f32
    y2 = jnp.maximum(y2, 0.0)

    # ---- second max-pool (over the 4 window-element groups) + Linear(32,1) --
    m = jnp.maximum(jnp.maximum(y2[:, 0:32], y2[:, 32:64]),
                    jnp.maximum(y2[:, 64:96], y2[:, 96:128]))     # (tb, 32)
    out = jnp.sum(m * wf_ref[...], axis=-1, keepdims=True) + bf_ref[...]
    o_ref[...] = out.astype(o_ref.dtype)


# ---------------------------------------------------------------------------
# Wrapper: builds the banded weight matrices (folding im2col, padding and pool
# ordering into them) and launches the fused pallas_call over batch tiles.
# ---------------------------------------------------------------------------
def discriminator_forward(x_nchw, params, *, batch_tile=1024):
    w1, b1, w2, b2, wf, bf = params
    f32, bf16 = jnp.float32, jnp.bfloat16
    B = x_nchw.shape[0]

    # pad 28x28 -> 30x30 once, split into the 10 non-overlapping conv1 row
    # windows (stride == kernel == 3), then stack windows per batch tile.
    x2 = x_nchw.reshape(B, 28, 28).astype(bf16)
    xp = jnp.pad(x2, ((0, 0), (1, 1), (1, 1)))                    # (B, 30, 30)
    xw = xp.reshape(B, 10, 90)                                     # lane = ki*30 + cp

    TB = min(batch_tile, _round_up(max(B, 1), 16))
    Bp = _round_up(B, TB)
    nt = Bp // TB            # big batches give >=2 grid tiles (v7x 2nd TC via "parallel")
    if Bp != B:
        xw = jnp.pad(xw, ((0, Bp - B), (0, 0), (0, 0)))
    xs = xw.reshape(nt, TB, 10, 90).transpose(0, 2, 1, 3).reshape(nt, 10 * TB, 90)

    # conv1 banded weight: A1[ki*30+cp, partner*128+pw*16+co]
    #   = w1[co, 0, ki, cp - 3*(2*pw+partner)]  (0 outside the band / pw>=5 pad)
    r1 = jnp.arange(90)
    ki1, cp1 = r1 // 30, r1 % 30
    j1 = jnp.arange(256)
    part1, rem1 = j1 // 128, j1 % 128
    pw1, co1 = rem1 // 16, rem1 % 16
    ow1 = 2 * pw1 + part1
    kj1 = cp1[:, None] - 3 * ow1[None, :]
    val1 = w1[co1[None, :], 0, ki1[:, None], jnp.clip(kj1, 0, 2)]
    a1 = jnp.where((kj1 >= 0) & (kj1 < 3) & (pw1[None, :] < 5),
                   val1, 0.0).astype(bf16)                          # (90, 256)
    b1t = jnp.where(pw1 < 5, b1[co1], 0.0).reshape(1, 256).astype(f32)

    # conv2 banded weight over the whole pooled map, output columns duplicated
    # per 2x2/stride-1 pool window:
    #   rows r = pr*128 + w*16 + ci   (pr = pooled row 0..4; lanes 80..127 are pad)
    #   cols j = s*32 + g*8 + co      (g = ph*2+pw pool cell, s = dh*2+dw window elem)
    #   A2[r, j] = w2[co, ci, pr+1-2*(ph+dh), w+1-2*(pw+dw)]   (0 outside the band)
    r2 = jnp.arange(640)
    pr2, lane2 = r2 // 128, r2 % 128
    w2c, ci2 = lane2 // 16, lane2 % 16
    j2 = jnp.arange(128)
    s2, g2, co2 = j2 // 32, (j2 % 32) // 8, j2 % 8
    oh2 = g2 // 2 + s2 // 2
    ow2 = g2 % 2 + s2 % 2
    ki2 = (pr2[:, None] + 1) - 2 * oh2[None, :]
    kj2 = (w2c[:, None] + 1) - 2 * ow2[None, :]
    val2 = w2[co2[None, :], ci2[:, None], jnp.clip(ki2, 0, 2), jnp.clip(kj2, 0, 2)]
    a2 = jnp.where((ki2 >= 0) & (ki2 < 3) & (kj2 >= 0) & (kj2 < 3)
                   & (w2c[:, None] < 5), val2, 0.0).astype(bf16)    # (640, 128)
    b2t = b2[co2].reshape(1, 128).astype(f32)

    # Linear(32,1): PyTorch view(-1,32) order is feature = c*4 + (ph*2+pw) = c*4 + g
    j3 = jnp.arange(32)
    g3, c3 = j3 // 8, j3 % 8
    wfr = wf[0, c3 * 4 + g3].reshape(1, 32).astype(f32)
    bfr = bf.reshape(1, 1).astype(f32)

    flops = nt * TB * (2 * 10 * 90 * 256 + 2 * 640 * 128 + 4 * 128 + 2 * 32)
    bytes_acc = (nt * TB * (10 * 90 * 2 + 4)
                 + (90 * 256 + 640 * 128) * 2 + (256 + 128 + 33) * 4)

    out = pl.pallas_call(
        _disc_kernel,
        out_shape=jax.ShapeDtypeStruct((Bp, 1), f32),
        grid=(nt,),
        in_specs=[
            pl.BlockSpec((1, 10 * TB, 90), lambda i: (i, 0, 0)),
            pl.BlockSpec((90, 256), lambda i: (0, 0)),
            pl.BlockSpec((1, 256), lambda i: (0, 0)),
            pl.BlockSpec((640, 128), lambda i: (0, 0)),
            pl.BlockSpec((1, 128), lambda i: (0, 0)),
            pl.BlockSpec((1, 32), lambda i: (0, 0)),
            pl.BlockSpec((1, 1), lambda i: (0, 0)),
        ],
        out_specs=pl.BlockSpec((TB, 1), lambda i: (i, 0)),
        scratch_shapes=[pltpu.VMEM((TB, 640), bf16)],
        compiler_params=pltpu.CompilerParams(
            dimension_semantics=("parallel",),
            vmem_limit_bytes=48 * 1024 * 1024),
        cost_estimate=pl.CostEstimate(
            flops=int(flops), transcendentals=0, bytes_accessed=int(bytes_acc)),
    )(xs, a1, b1t, a2, b2t, wfr, bfr)
    return out[:B]


# ---------------------------------------------------------------------------
# Pure-JAX reference (correctness check only)
# ---------------------------------------------------------------------------
def reference_forward(x_nchw, params):
    w1, b1, w2, b2, wf, bf = params
    dn = ('NCHW', 'OIHW', 'NCHW')
    y = lax.conv_general_dilated(x_nchw, w1, (3, 3), ((1, 1), (1, 1)),
                                 dimension_numbers=dn)
    y = jnp.maximum(y + b1[None, :, None, None], 0.0)
    y = lax.reduce_window(y, -jnp.inf, lax.max, (1, 1, 2, 2), (1, 1, 2, 2), 'VALID')
    y = lax.conv_general_dilated(y, w2, (2, 2), ((1, 1), (1, 1)),
                                 dimension_numbers=dn)
    y = jnp.maximum(y + b2[None, :, None, None], 0.0)
    y = lax.reduce_window(y, -jnp.inf, lax.max, (1, 1, 2, 2), (1, 1, 1, 1), 'VALID')
    feat = y.reshape(y.shape[0], -1)
    return feat @ wf.T + bf[None, :]


if __name__ == "__main__":
    key = jax.random.PRNGKey(0)
    ks = jax.random.split(key, 7)
    # Synthetic parameters with the shapes from Discriminator.__init__
    w1 = jax.random.normal(ks[0], (16, 1, 3, 3), jnp.float32) * 0.2
    b1 = jax.random.normal(ks[1], (16,), jnp.float32) * 0.1
    w2 = jax.random.normal(ks[2], (8, 16, 3, 3), jnp.float32) * 0.1
    b2 = jax.random.normal(ks[3], (8,), jnp.float32) * 0.1
    wf = jax.random.normal(ks[4], (1, 32), jnp.float32) * 0.1
    bf = jax.random.normal(ks[5], (1,), jnp.float32) * 0.1
    params = (w1, b1, w2, b2, wf, bf)

    # MNIST-shaped input (batch=2): view(-1, 32) implies 1x28x28 input.
    x = jax.random.normal(ks[6], (2, 1, 28, 28), jnp.float32)

    fwd = jax.jit(discriminator_forward)
    out = jax.block_until_ready(fwd(x, params))

    ref = reference_forward(x, params)
    assert out.shape == (2, 1), out.shape
    # bf16 MXU inputs (per perf review) -> looser tolerance than the all-f32 version
    assert jnp.allclose(out, ref, atol=5e-2, rtol=5e-2), (out, ref)

    print("KERNEL_OK")
</pallas_src>

<mosaic_0001>
module attributes {stable_mosaic.version = 11 : i64} {
  func.func @_disc_kernel(%arg0: i32, %arg1: memref<1x160x90xbf16, #tpu.memory_space<vmem>>, %arg2: memref<90x256xbf16, #tpu.memory_space<vmem>>, %arg3: memref<1x256xf32, #tpu.memory_space<vmem>>, %arg4: memref<640x128xbf16, #tpu.memory_space<vmem>>, %arg5: memref<1x128xf32, #tpu.memory_space<vmem>>, %arg6: memref<1x32xf32, #tpu.memory_space<vmem>>, %arg7: memref<1x1xf32, #tpu.memory_space<vmem>>, %arg8: memref<16x1xf32, #tpu.memory_space<vmem>>, %arg9: memref<16x640xbf16, #tpu.memory_space<vmem>>) attributes {dimension_semantics = [#tpu.dimension_semantics<parallel>], iteration_bounds = array<i64: 1>, scalar_prefetch = 0 : i64, scratch_operands = 1 : i64, tpu.core_type = #tpu.core_type<tc>, window_params = [{transform_indices = @transform_0, window_bounds = array<i64: 1, 160, 90>}, {pipeline_mode = #tpu.pipeline_mode<synchronous>, transform_indices = @transform_1, window_bounds = array<i64: 90, 256>}, {pipeline_mode = #tpu.pipeline_mode<synchronous>, transform_indices = @transform_2, window_bounds = array<i64: 1, 256>}, {pipeline_mode = #tpu.pipeline_mode<synchronous>, transform_indices = @transform_3, window_bounds = array<i64: 640, 128>}, {pipeline_mode = #tpu.pipeline_mode<synchronous>, transform_indices = @transform_4, window_bounds = array<i64: 1, 128>}, {pipeline_mode = #tpu.pipeline_mode<synchronous>, transform_indices = @transform_5, window_bounds = array<i64: 1, 32>}, {pipeline_mode = #tpu.pipeline_mode<synchronous>, transform_indices = @transform_6, window_bounds = array<i64: 1, 1>}, {transform_indices = @transform_7, window_bounds = array<i64: 16, 1>}]} {
    %c0 = arith.constant 0 : index
    %c0_0 = arith.constant 0 : index
    %0 = vector.load %arg2[%c0, %c0_0] : memref<90x256xbf16, #tpu.memory_space<vmem>>, vector<90x256xbf16>
    %c0_1 = arith.constant 0 : index
    %c0_2 = arith.constant 0 : index
    %1 = vector.load %arg3[%c0_1, %c0_2] : memref<1x256xf32, #tpu.memory_space<vmem>>, vector<1x256xf32>
    %c0_3 = arith.constant 0 : index
    %c0_4 = arith.constant 0 : index
    %c0_5 = arith.constant 0 : index
    %2 = vector.load %arg1[%c0_3, %c0_4, %c0_5] : memref<1x160x90xbf16, #tpu.memory_space<vmem>>, vector<1x32x90xbf16>
    %3 = vector.shape_cast %2 : vector<1x32x90xbf16> to vector<32x90xbf16>
    %cst = arith.constant dense<0.000000e+00> : vector<32x256xf32>
    %4 = tpu.matmul %3, %0, %cst {dimension_numbers = #tpu.dot_dimension_numbers<[1], [0], [0], [1], [0, 0, 1, 1], [], []>} : vector<32x90xbf16>, vector<90x256xbf16>, vector<32x256xf32> -> vector<32x256xf32>
    %5 = vector.broadcast %1 : vector<1x256xf32> to vector<32x256xf32>
    %6 = arith.addf %4, %5 : vector<32x256xf32>
    %cst_6 = arith.constant 0.000000e+00 : f32
    %7 = vector.broadcast %cst_6 : f32 to vector<32x256xf32>
    %8 = arith.maximumf %6, %7 : vector<32x256xf32>
    %9 = vector.extract_strided_slice %8 {offsets = [0, 0], sizes = [16, 256], strides = [1, 1]} : vector<32x256xf32> to vector<16x256xf32>
    %10 = vector.extract_strided_slice %8 {offsets = [16, 0], sizes = [16, 256], strides = [1, 1]} : vector<32x256xf32> to vector<16x256xf32>
    %11 = arith.maximumf %9, %10 : vector<16x256xf32>
    %12 = vector.extract_strided_slice %11 {offsets = [0, 0], sizes = [16, 128], strides = [1, 1]} : vector<16x256xf32> to vector<16x128xf32>
    %13 = vector.extract_strided_slice %11 {offsets = [0, 128], sizes = [16, 128], strides = [1, 1]} : vector<16x256xf32> to vector<16x128xf32>
    %14 = arith.maximumf %12, %13 : vector<16x128xf32>
    %15 = arith.truncf %14 : vector<16x128xf32> to vector<16x128xbf16>
    %c0_7 = arith.constant 0 : index
    %c0_8 = arith.constant 0 : index
    %16 = vector.load %arg9[%c0_7, %c0_8] : memref<16x640xbf16, #tpu.memory_space<vmem>>, vector<16x128xbf16>
    tpu.vector_store %arg9[%c0_7, %c0_8], %15 {strides = array<i32>} : memref<16x640xbf16, #tpu.memory_space<vmem>>, vector<16x128xbf16>,
    %c0_9 = arith.constant 0 : index
    %c32 = arith.constant 32 : index
    %c0_10 = arith.constant 0 : index
    %17 = vector.load %arg1[%c0_9, %c32, %c0_10] : memref<1x160x90xbf16, #tpu.memory_space<vmem>>, vector<1x32x90xbf16>
    %18 = vector.shape_cast %17 : vector<1x32x90xbf16> to vector<32x90xbf16>
    %cst_11 = arith.constant dense<0.000000e+00> : vector<32x256xf32>
    %19 = tpu.matmul %18, %0, %cst_11 {dimension_numbers = #tpu.dot_dimension_numbers<[1], [0], [0], [1], [0, 0, 1, 1], [], []>} : vector<32x90xbf16>, vector<90x256xbf16>, vector<32x256xf32> -> vector<32x256xf32>
    %20 = vector.broadcast %1 : vector<1x256xf32> to vector<32x256xf32>
    %21 = arith.addf %19, %20 : vector<32x256xf32>
    %cst_12 = arith.constant 0.000000e+00 : f32
    %22 = vector.broadcast %cst_12 : f32 to vector<32x256xf32>
    %23 = arith.maximumf %21, %22 : vector<32x256xf32>
    %24 = vector.extract_strided_slice %23 {offsets = [0, 0], sizes = [16, 256], strides = [1, 1]} : vector<32x256xf32> to vector<16x256xf32>
    %25 = vector.extract_strided_slice %23 {offsets = [16, 0], sizes = [16, 256], strides = [1, 1]} : vector<32x256xf32> to vector<16x256xf32>
    %26 = arith.maximumf %24, %25 : vector<16x256xf32>
    %27 = vector.extract_strided_slice %26 {offsets = [0, 0], sizes = [16, 128], strides = [1, 1]} : vector<16x256xf32> to vector<16x128xf32>
    %28 = vector.extract_strided_slice %26 {offsets = [0, 128], sizes = [16, 128], strides = [1, 1]} : vector<16x256xf32> to vector<16x128xf32>
    %29 = arith.maximumf %27, %28 : vector<16x128xf32>
    %30 = arith.truncf %29 : vector<16x128xf32> to vector<16x128xbf16>
    %c0_13 = arith.constant 0 : index
    %c128 = arith.constant 128 : index
    %31 = vector.load %arg9[%c0_13, %c128] : memref<16x640xbf16, #tpu.memory_space<vmem>>, vector<16x128xbf16>
    tpu.vector_store %arg9[%c0_13, %c128], %30 {strides = array<i32>} : memref<16x640xbf16, #tpu.memory_space<vmem>>, vector<16x128xbf16>,
    %c0_14 = arith.constant 0 : index
    %c64 = arith.constant 64 : index
    %c0_15 = arith.constant 0 : index
    %32 = vector.load %arg1[%c0_14, %c64, %c0_15] : memref<1x160x90xbf16, #tpu.memory_space<vmem>>, vector<1x32x90xbf16>
    %33 = vector.shape_cast %32 : vector<1x32x90xbf16> to vector<32x90xbf16>
    %cst_16 = arith.constant dense<0.000000e+00> : vector<32x256xf32>
    %34 = tpu.matmul %33, %0, %cst_16 {dimension_numbers = #tpu.dot_dimension_numbers<[1], [0], [0], [1], [0, 0, 1, 1], [], []>} : vector<32x90xbf16>, vector<90x256xbf16>, vector<32x256xf32> -> vector<32x256xf32>
    %35 = vector.broadcast %1 : vector<1x256xf32> to vector<32x256xf32>
    %36 = arith.addf %34, %35 : vector<32x256xf32>
    %cst_17 = arith.constant 0.000000e+00 : f32
    %37 = vector.broadcast %cst_17 : f32 to vector<32x256xf32>
    %38 = arith.maximumf %36, %37 : vector<32x256xf32>
    %39 = vector.extract_strided_slice %38 {offsets = [0, 0], sizes = [16, 256], strides = [1, 1]} : vector<32x256xf32> to vector<16x256xf32>
    %40 = vector.extract_strided_slice %38 {offsets = [16, 0], sizes = [16, 256], strides = [1, 1]} : vector<32x256xf32> to vector<16x256xf32>
    %41 = arith.maximumf %39, %40 : vector<16x256xf32>
    %42 = vector.extract_strided_slice %41 {offsets = [0, 0], sizes = [16, 128], strides = [1, 1]} : vector<16x256xf32> to vector<16x128xf32>
    %43 = vector.extract_strided_slice %41 {offsets = [0, 128], sizes = [16, 128], strides = [1, 1]} : vector<16x256xf32> to vector<16x128xf32>
    %44 = arith.maximumf %42, %43 : vector<16x128xf32>
    %45 = arith.truncf %44 : vector<16x128xf32> to vector<16x128xbf16>
    %c0_18 = arith.constant 0 : index
    %c256 = arith.constant 256 : index
    %46 = vector.load %arg9[%c0_18, %c256] : memref<16x640xbf16, #tpu.memory_space<vmem>>, vector<16x128xbf16>
    tpu.vector_store %arg9[%c0_18, %c256], %45 {strides = array<i32>} : memref<16x640xbf16, #tpu.memory_space<vmem>>, vector<16x128xbf16>,
    %c0_19 = arith.constant 0 : index
    %c96 = arith.constant 96 : index
    %c0_20 = arith.constant 0 : index
    %47 = vector.load %arg1[%c0_19, %c96, %c0_20] : memref<1x160x90xbf16, #tpu.memory_space<vmem>>, vector<1x32x90xbf16>
    %48 = vector.shape_cast %47 : vector<1x32x90xbf16> to vector<32x90xbf16>
    %cst_21 = arith.constant dense<0.000000e+00> : vector<32x256xf32>
    %49 = tpu.matmul %48, %0, %cst_21 {dimension_numbers = #tpu.dot_dimension_numbers<[1], [0], [0], [1], [0, 0, 1, 1], [], []>} : vector<32x90xbf16>, vector<90x256xbf16>, vector<32x256xf32> -> vector<32x256xf32>
    %50 = vector.broadcast %1 : vector<1x256xf32> to vector<32x256xf32>
    %51 = arith.addf %49, %50 : vector<32x256xf32>
    %cst_22 = arith.constant 0.000000e+00 : f32
    %52 = vector.broadcast %cst_22 : f32 to vector<32x256xf32>
    %53 = arith.maximumf %51, %52 : vector<32x256xf32>
    %54 = vector.extract_strided_slice %53 {offsets = [0, 0], sizes = [16, 256], strides = [1, 1]} : vector<32x256xf32> to vector<16x256xf32>
    %55 = vector.extract_strided_slice %53 {offsets = [16, 0], sizes = [16, 256], strides = [1, 1]} : vector<32x256xf32> to vector<16x256xf32>
    %56 = arith.maximumf %54, %55 : vector<16x256xf32>
    %57 = vector.extract_strided_slice %56 {offsets = [0, 0], sizes = [16, 128], strides = [1, 1]} : vector<16x256xf32> to vector<16x128xf32>
    %58 = vector.extract_strided_slice %56 {offsets = [0, 128], sizes = [16, 128], strides = [1, 1]} : vector<16x256xf32> to vector<16x128xf32>
    %59 = arith.maximumf %57, %58 : vector<16x128xf32>
    %60 = arith.truncf %59 : vector<16x128xf32> to vector<16x128xbf16>
    %c0_23 = arith.constant 0 : index
    %c384 = arith.constant 384 : index
    %61 = vector.load %arg9[%c0_23, %c384] : memref<16x640xbf16, #tpu.memory_space<vmem>>, vector<16x128xbf16>
    tpu.vector_store %arg9[%c0_23, %c384], %60 {strides = array<i32>} : memref<16x640xbf16, #tpu.memory_space<vmem>>, vector<16x128xbf16>,
    %c0_24 = arith.constant 0 : index
    %c128_25 = arith.constant 128 : index
    %c0_26 = arith.constant 0 : index
    %62 = vector.load %arg1[%c0_24, %c128_25, %c0_26] : memref<1x160x90xbf16, #tpu.memory_space<vmem>>, vector<1x32x90xbf16>
    %63 = vector.shape_cast %62 : vector<1x32x90xbf16> to vector<32x90xbf16>
    %cst_27 = arith.constant dense<0.000000e+00> : vector<32x256xf32>
    %64 = tpu.matmul %63, %0, %cst_27 {dimension_numbers = #tpu.dot_dimension_numbers<[1], [0], [0], [1], [0, 0, 1, 1], [], []>} : vector<32x90xbf16>, vector<90x256xbf16>, vector<32x256xf32> -> vector<32x256xf32>
    %65 = vector.broadcast %1 : vector<1x256xf32> to vector<32x256xf32>
    %66 = arith.addf %64, %65 : vector<32x256xf32>
    %cst_28 = arith.constant 0.000000e+00 : f32
    %67 = vector.broadcast %cst_28 : f32 to vector<32x256xf32>
    %68 = arith.maximumf %66, %67 : vector<32x256xf32>
    %69 = vector.extract_strided_slice %68 {offsets = [0, 0], sizes = [16, 256], strides = [1, 1]} : vector<32x256xf32> to vector<16x256xf32>
    %70 = vector.extract_strided_slice %68 {offsets = [16, 0], sizes = [16, 256], strides = [1, 1]} : vector<32x256xf32> to vector<16x256xf32>
    %71 = arith.maximumf %69, %70 : vector<16x256xf32>
    %72 = vector.extract_strided_slice %71 {offsets = [0, 0], sizes = [16, 128], strides = [1, 1]} : vector<16x256xf32> to vector<16x128xf32>
    %73 = vector.extract_strided_slice %71 {offsets = [0, 128], sizes = [16, 128], strides = [1, 1]} : vector<16x256xf32> to vector<16x128xf32>
    %74 = arith.maximumf %72, %73 : vector<16x128xf32>
    %75 = arith.truncf %74 : vector<16x128xf32> to vector<16x128xbf16>
    %c0_29 = arith.constant 0 : index
    %c512 = arith.constant 512 : index
    %76 = vector.load %arg9[%c0_29, %c512] : memref<16x640xbf16, #tpu.memory_space<vmem>>, vector<16x128xbf16>
    tpu.vector_store %arg9[%c0_29, %c512], %75 {strides = array<i32>} : memref<16x640xbf16, #tpu.memory_space<vmem>>, vector<16x128xbf16>,
    %c0_30 = arith.constant 0 : index
    %c0_31 = arith.constant 0 : index
    %77 = vector.load %arg9[%c0_30, %c0_31] : memref<16x640xbf16, #tpu.memory_space<vmem>>, vector<16x640xbf16>
    %c0_32 = arith.constant 0 : index
    %c0_33 = arith.constant 0 : index
    %78 = vector.load %arg4[%c0_32, %c0_33] : memref<640x128xbf16, #tpu.memory_space<vmem>>, vector<640x128xbf16>
    %cst_34 = arith.constant dense<0.000000e+00> : vector<16x128xf32>
    %79 = tpu.matmul %77, %78, %cst_34 {dimension_numbers = #tpu.dot_dimension_numbers<[1], [0], [0], [1], [0, 0, 1, 1], [], []>} : vector<16x640xbf16>, vector<640x128xbf16>, vector<16x128xf32> -> vector<16x128xf32>
    %c0_35 = arith.constant 0 : index
    %c0_36 = arith.constant 0 : index
    %80 = vector.load %arg5[%c0_35, %c0_36] : memref<1x128xf32, #tpu.memory_space<vmem>>, vector<1x128xf32>
    %81 = vector.broadcast %80 : vector<1x128xf32> to vector<16x128xf32>
    %82 = arith.addf %79, %81 : vector<16x128xf32>
    %cst_37 = arith.constant 0.000000e+00 : f32
    %83 = vector.broadcast %cst_37 : f32 to vector<16x128xf32>
    %84 = arith.maximumf %82, %83 : vector<16x128xf32>
    %85 = vector.extract_strided_slice %84 {offsets = [0, 0], sizes = [16, 32], strides = [1, 1]} : vector<16x128xf32> to vector<16x32xf32>
    %86 = vector.extract_strided_slice %84 {offsets = [0, 32], sizes = [16, 32], strides = [1, 1]} : vector<16x128xf32> to vector<16x32xf32>
    %87 = arith.maximumf %85, %86 : vector<16x32xf32>
    %88 = vector.extract_strided_slice %84 {offsets = [0, 64], sizes = [16, 32], strides = [1, 1]} : vector<16x128xf32> to vector<16x32xf32>
    %89 = vector.extract_strided_slice %84 {offsets = [0, 96], sizes = [16, 32], strides = [1, 1]} : vector<16x128xf32> to vector<16x32xf32>
    %90 = arith.maximumf %88, %89 : vector<16x32xf32>
    %91 = arith.maximumf %87, %90 : vector<16x32xf32>
    %c0_38 = arith.constant 0 : index
    %c0_39 = arith.constant 0 : index
    %92 = vector.load %arg6[%c0_38, %c0_39] : memref<1x32xf32, #tpu.memory_space<vmem>>, vector<1x32xf32>
    %93 = vector.broadcast %92 : vector<1x32xf32> to vector<16x32xf32>
    %94 = arith.mulf %91, %93 : vector<16x32xf32>
    %cst_40 = arith.constant dense<0.000000e+00> : vector<16xf32>
    %95 = vector.multi_reduction <add>, %94, %cst_40 [1] : vector<16x32xf32> to vector<16xf32>
    %96 = vector.shape_cast %95 : vector<16xf32> to vector<16x1xf32>
    %c0_41 = arith.constant 0 : index
    %c0_42 = arith.constant 0 : index
    %97 = vector.load %arg7[%c0_41, %c0_42] : memref<1x1xf32, #tpu.memory_space<vmem>>, vector<1x1xf32>
    %98 = vector.broadcast %97 : vector<1x1xf32> to vector<16x1xf32>
    %99 = arith.addf %96, %98 : vector<16x1xf32>
    %c0_43 = arith.constant 0 : index
    %c0_44 = arith.constant 0 : index
    %100 = vector.load %arg8[%c0_43, %c0_44] : memref<16x1xf32, #tpu.memory_space<vmem>>, vector<16x1xf32>
    tpu.vector_store %arg8[%c0_43, %c0_44], %99 {strides = array<i32>} : memref<16x1xf32, #tpu.memory_space<vmem>>, vector<16x1xf32>,
    return
  }
  func.func @transform_0(%arg0: i32) -> (i32, i32, i32) {
    %c0_i32 = arith.constant 0 : i32
    %c0_i32_0 = arith.constant 0 : i32
    %c0_i32_1 = arith.constant 0 : i32
    return %arg0, %c0_i32, %c0_i32_0 : i32, i32, i32
  }
  func.func @transform_1(%arg0: i32) -> (i32, i32) {
    %c0_i32 = arith.constant 0 : i32
    %c0_i32_0 = arith.constant 0 : i32
    %c0_i32_1 = arith.constant 0 : i32
    return %c0_i32, %c0_i32_0 : i32, i32
  }
  func.func @transform_2(%arg0: i32) -> (i32, i32) {
    %c0_i32 = arith.constant 0 : i32
    %c0_i32_0 = arith.constant 0 : i32
    %c0_i32_1 = arith.constant 0 : i32
    return %c0_i32, %c0_i32_0 : i32, i32
  }
  func.func @transform_3(%arg0: i32) -> (i32, i32) {
    %c0_i32 = arith.constant 0 : i32
    %c0_i32_0 = arith.constant 0 : i32
    %c0_i32_1 = arith.constant 0 : i32
    return %c0_i32, %c0_i32_0 : i32, i32
  }
  func.func @transform_4(%arg0: i32) -> (i32, i32) {
    %c0_i32 = arith.constant 0 : i32
    %c0_i32_0 = arith.constant 0 : i32
    %c0_i32_1 = arith.constant 0 : i32
    return %c0_i32, %c0_i32_0 : i32, i32
  }
  func.func @transform_5(%arg0: i32) -> (i32, i32) {
    %c0_i32 = arith.constant 0 : i32
    %c0_i32_0 = arith.constant 0 : i32
    %c0_i32_1 = arith.constant 0 : i32
    return %c0_i32, %c0_i32_0 : i32, i32
  }
  func.func @transform_6(%arg0: i32) -> (i32, i32) {
    %c0_i32 = arith.constant 0 : i32
    %c0_i32_0 = arith.constant 0 : i32
    %c0_i32_1 = arith.constant 0 : i32
    return %c0_i32, %c0_i32_0 : i32, i32
  }
  func.func @transform_7(%arg0: i32) -> (i32, i32) {
    %c0_i32 = arith.constant 0 : i32
    %c0_i32_0 = arith.constant 0 : i32
    return %arg0, %c0_i32 : i32, i32
  }
}

</mosaic_0001>

<bundles_post_ra>
// kernel: discriminator_forward.1
= control target key start
LH: loop header
LB: loop body
LE: loop exit
PB: predicated region body
PF: predicated region fallthrough
CT: control target
= control target key end

     0   :  { %v1299_v1 = vmov 0   ;;  %vm132_vm0 = vcmask 1044480   ;;  %vm125_vm1 = vcmask 736256   ;;  %v1300_v53 = vmov 0.0   ;;  %s1302_s27 = smov 96   ;;  %s1303_s29 = smov 64   ;;  %s1711_s1 = inlined_call_operand.vmem [shape: bf16[90,256], index: 1, kind: input, shape index: {}]   ;;  %s1712_s0 = inlined_call_operand.vmem [shape: bf16[1,160,90], index: 0, kind: input, shape index: {}]   ;;  %s1713_s3 = inlined_call_operand.vmem [shape: bf16[640,128], index: 3, kind: input, shape index: {}]   ;;  %s1714_s2 = inlined_call_operand.vmem [shape: f32[1,256], index: 2, kind: input, shape index: {}]   ;;  %s1715_s4 = inlined_call_operand.vmem [shape: f32[1,128], index: 4, kind: input, shape index: {}]   ;;  %s1716_s6 = inlined_call_operand.<no memory space> [shape: f32[1,1], index: 6, kind: input, shape index: {}]   ;;  %s1717_s5 = inlined_call_operand.vmem [shape: f32[1,32], index: 5, kind: input, shape index: {}]   ;;  %s1718_s7 = inlined_call_operand.vmem [shape: f32[16,1], index: 7, kind: output, shape index: {}]  }
   0x1   :  { %v1347_v0 = vld [vmem:[%s1711_s1 + $0x4] ss:$8 sps:$4 sm:$0xff]   ;;  %171 = vmatprep.mubr.bf16.mxu0 %v1299_v1  ;;  %260 = vmatprep.mubr.bf16.mxu1 %v1299_v1  ;;  %v1354_v2 = vld [vmem:[%s1711_s1] ss:$8 sps:$4 sm:$0xff]   ;;  %v1361_v3 = vld [vmem:[%s1711_s1 + $0x14] ss:$8 sps:$4 sm:$0xff]   ;;  %v47_v57 = vlaneseq }
   0x2   :  { %139 = vmatprep.subr.bf16.mxu0 %v1347_v0  ;;  %228 = vmatprep.subr.bf16.mxu1 %v1347_v0  ;;  %v1368_v4 = vld [vmem:[%s1711_s1 + $0x10] ss:$8 sps:$4 sm:$0xff]   ;;  %v1375_v5 = vld [vmem:[%s1711_s1 + $0x24] ss:$8 sps:$4 sm:$0xff]   ;;  %v1382_v6 = vld [vmem:[%s1711_s1 + $0x20] ss:$8 sps:$4 sm:$0xff]  }
   0x3   :  { %140 = vmatpush1.bf16.msra.mxu0 %v1354_v2  ;;  %229 = vmatpush1.bf16.msra.mxu1 %v1354_v2  ;;  %v1389_v7 = vld [vmem:[%s1711_s1 + $0x34] ss:$8 sps:$4 sm:$0xff]   ;;  %v1396_v8 = vld [vmem:[%s1711_s1 + $0x30] ss:$8 sps:$4 sm:$0xff]   ;;  %v1403_v9 = vld [vmem:[%s1711_s1 + $0x44] ss:$8 sps:$4 sm:$0xff]  }
   0x4   :  { %141 = vmatprep.subr.bf16.mxu0 %v1361_v3  ;;  %230 = vmatprep.subr.bf16.mxu1 %v1361_v3  ;;  %v1408_v10 = vld [vmem:[%s1711_s1 + $0x54] ss:$8 sps:$4 sm:$0x1f]   ;;  %v1248_v11 = vld [vmem:[%s1711_s1 + $0x50] ss:$8 sps:$4 sm:$0x1f]  }
   0x5   :  { %v1418_v12 = vld [vmem:[%s1711_s1 + $0x40] ss:$8 sps:$4 sm:$0xff]   ;;  %v1429_v13 = vsel %vm132_vm0, %v1248_v11, 0  ;;  %v1250_v15 = vld [vmem:[%s1712_s0 + $0x10] sm:$0xff]   ;;  %v1252_v17 = vld [vmem:[%s1712_s0 + $0x18] sm:$0xff]   ;;  %v48_v58 = vshrl.u32 %v47_v57, 7 }
   0x6   :  { %v1249_v14 = vld [vmem:[%s1712_s0] sm:$0xff]   ;;  %v1251_v16 = vld [vmem:[%s1712_s0 + $0x8] sm:$0xff]   ;;  %v1254_v20 = vld [vmem:[%s1712_s0 + $0x30] sm:$0xff]   ;;  %vm1301_vm2 = vmmov 0   ;;  %vm1050_vm3 = vcmask 261120   ;;  %vm1066_vm4 = vcmask 7168  }
   0x7   :  { %142 = vmatpush1.bf16.msra.mxu0 %v1368_v4  ;;  %231 = vmatpush1.bf16.msra.mxu1 %v1368_v4  ;;  %v1259_v18 = vld [vmem:[%s1713_s3 + $0x40] sm:$0xff]   ;;  %v1261_v22 = vld [vmem:[%s1713_s3 + $0x48] sm:$0xff]   ;;  %v1256_v25 = vld [vmem:[%s1712_s0 + $0x38] sm:$0xff]   ;;  %v49_v59 = vsub.s32 0, %v48_v58  ;;  %v53_v60 = vsub.s32 1, %v48_v58 }
   0x8   :  { %143 = vmatprep.subr.bf16.mxu0 %v1375_v5  ;;  %232 = vmatprep.subr.bf16.mxu1 %v1375_v5  ;;  %v1253_v19 = vld [vmem:[%s1712_s0 + $0x20] sm:$0xff]   ;;  %v1262_v23 = vld [vmem:[%s1713_s3 + $0x8] sm:$0xff]   ;;  %v1263_v26 = vld [vmem:[%s1713_s3 + $0x50] sm:$0xff]  }
   0x9   :  { %v1260_v21 = vld [vmem:[%s1713_s3] sm:$0xff]   ;;  %v1255_v24 = vld [vmem:[%s1712_s0 + $0x28] sm:$0xff]   ;;  %v1264_v29 = vld [vmem:[%s1713_s3 + $0x10] sm:$0xff]  }
   0xa   :  { %v1257_v27 = vld [vmem:[%s1712_s0 + $0x40] sm:$0xff]   ;;  %v1258_v28 = vld [vmem:[%s1712_s0 + $0x48] sm:$0xff]   ;;  %v1265_v30 = vld [vmem:[%s1713_s3 + $0x58] sm:$0xff]  }
   0xb   :  { %144 = vmatpush1.bf16.msra.mxu0 %v1382_v6  ;;  %233 = vmatpush1.bf16.msra.mxu1 %v1382_v6  ;;  %v1266_v31 = vld [vmem:[%s1713_s3 + $0x18] sm:$0xff]   ;;  %v1267_v32 = vld [vmem:[%s1713_s3 + $0x60] sm:$0xff]   ;;  %v1269_v34 = vld [vmem:[%s1713_s3 + $0x68] sm:$0xff]  }
   0xc   :  { %145 = vmatprep.subr.bf16.mxu0 %v1389_v7  ;;  %234 = vmatprep.subr.bf16.mxu1 %v1389_v7  ;;  %v1268_v33 = vld [vmem:[%s1713_s3 + $0x20] sm:$0xff]   ;;  %v1270_v35 = vld [vmem:[%s1713_s3 + $0x28] sm:$0xff]   ;;  %v1271_v36 = vld [vmem:[%s1713_s3 + $0x70] sm:$0xff]  }
   0xd   :  { %v1272_v37 = vld [vmem:[%s1713_s3 + $0xc0] sm:$0xff]   ;;  %v1273_v38 = vld [vmem:[%s1713_s3 + $0x30] sm:$0xff]   ;;  %v1275_v40 = vld [vmem:[%s1713_s3 + $0x78] sm:$0xff]  }
   0xe   :  { %v1274_v39 = vld [vmem:[%s1713_s3 + $0x80] sm:$0xff]   ;;  %v1276_v41 = vld [vmem:[%s1713_s3 + $0xc8] sm:$0xff]   ;;  %v1277_v42 = vld [vmem:[%s1713_s3 + $0x38] sm:$0xff]  }
   0xf   :  { %146 = vmatpush1.bf16.msra.mxu0 %v1396_v8  ;;  %235 = vmatpush1.bf16.msra.mxu1 %v1396_v8  ;;  %v1278_v43 = vld [vmem:[%s1713_s3 + $0x88] sm:$0xff]   ;;  %v1279_v44 = vld [vmem:[%s1713_s3 + $0xd0] sm:$0xff]   ;;  %v1281_v46 = vld [vmem:[%s1713_s3 + $0xd8] sm:$0xff]  }
  0x10   :  { %147 = vmatprep.subr.bf16.mxu0 %v1403_v9  ;;  %236 = vmatprep.subr.bf16.mxu1 %v1403_v9  ;;  %v1280_v45 = vld [vmem:[%s1713_s3 + $0x90] sm:$0xff]   ;;  %v1282_v47 = vld [vmem:[%s1713_s3 + $0x98] sm:$0xff]   ;;  %v1283_v48 = vld [vmem:[%s1713_s3 + $0xe0] sm:$0xff]  }
  0x11   :  { %v1284_v49 = vld [vmem:[%s1713_s3 + $0xa0] sm:$0xff]   ;;  %v1285_v50 = vld [vmem:[%s1713_s3 + $0xe8] sm:$0xff]   ;;  %v1287_v52 = vld [vmem:[%s1713_s3 + $0xf0] sm:$0xff]  }
  0x12   :  { %v1286_v51 = vld [vmem:[%s1713_s3 + $0xa8] sm:$0xff]   ;;  %v1289_v54 = vld [vmem:[%s1713_s3 + $0xb0] sm:$0xff]   ;;  %v1290_v55 = vld [vmem:[%s1713_s3 + $0xf8] sm:$0xff]  }
  0x13   :  { %148 = vmatpush1.bf16.msra.mxu0 %v1418_v12  ;;  %237 = vmatpush1.bf16.msra.mxu1 %v1418_v12  ;;  %v1292_v56 = vld [vmem:[%s1713_s3 + $0xb8] sm:$0xff]   ;;  %v41_v61 = vld [vmem:[%s1714_s2] sm:$0x3] }
  0x14   :  { %1087 = vmatprep.subr.msk.bf16.mxu0 %vm132_vm0, %v1408_v10  ;;  %1092 = vmatprep.subr.msk.bf16.mxu1 %vm132_vm0, %v1408_v10  ;;  %v1620_v62 = vrot.slane %v41_v61, %v49_v59 }
  0x17   :  { %150 = vmatpush1.bf16.msra.mxu0 %v1429_v13  ;;  %239 = vmatpush1.bf16.msra.mxu1 %v1429_v13 }
  0x18   :  { %317 = vmatprep.subr.bf16.mxu0 %v1347_v0  ;;  %406 = vmatprep.subr.bf16.mxu1 %v1347_v0 }
  0x1a   :  { %1088 = vmatmul.mubr.msk.bf16.vlgmr.msra.gmra.mrb[0].mxu0 %vm125_vm1, %v1249_v14  ;;  %1093 = vmatmul.mubr.msk.bf16.vlgmr.msra.gmra.mrb[0].mxu1 %vm125_vm1, %v1250_v15 }
  0x1b   :  { %318 = vmatpush1.bf16.msra.mxu0 %v1354_v2  ;;  %407 = vmatpush1.bf16.msra.mxu1 %v1354_v2 }
  0x1c   :  { %319 = vmatprep.subr.bf16.mxu0 %v1361_v3  ;;  %408 = vmatprep.subr.bf16.mxu1 %v1361_v3 }
  0x1d   :  { %181 = vmatprep.mubr.bf16.mxu0 %v1299_v1  ;;  %270 = vmatprep.mubr.bf16.mxu1 %v1299_v1 }
  0x1f   :  { %320 = vmatpush1.bf16.msra.mxu0 %v1368_v4  ;;  %409 = vmatpush1.bf16.msra.mxu1 %v1368_v4 }
  0x20   :  { %321 = vmatprep.subr.bf16.mxu0 %v1375_v5  ;;  %410 = vmatprep.subr.bf16.mxu1 %v1375_v5 }
  0x22   :  { %1089 = vmatmul.mubr.msk.bf16.gmra.mrb[4].mxu0 %vm125_vm1, %v1251_v16  ;;  %1094 = vmatmul.mubr.msk.bf16.gmra.mrb[4].mxu1 %vm125_vm1, %v1252_v17 }
  0x23   :  { %322 = vmatpush1.bf16.msra.mxu0 %v1382_v6  ;;  %411 = vmatpush1.bf16.msra.mxu1 %v1382_v6 }
  0x24   :  { %323 = vmatprep.subr.bf16.mxu0 %v1389_v7  ;;  %412 = vmatprep.subr.bf16.mxu1 %v1389_v7 }
  0x25   :  { %349 = vmatprep.mubr.bf16.mxu0 %v1299_v1  ;;  %438 = vmatprep.mubr.bf16.mxu1 %v1299_v1 }
  0x27   :  { %324 = vmatpush1.bf16.msra.mxu0 %v1396_v8  ;;  %413 = vmatpush1.bf16.msra.mxu1 %v1396_v8 }
  0x28   :  { %325 = vmatprep.subr.bf16.mxu0 %v1403_v9  ;;  %414 = vmatprep.subr.bf16.mxu1 %v1403_v9 }
  0x2b   :  { %326 = vmatpush1.bf16.msra.mxu0 %v1418_v12  ;;  %415 = vmatpush1.bf16.msra.mxu1 %v1418_v12 }
  0x2c   :  { %1097 = vmatprep.subr.msk.bf16.mxu0 %vm132_vm0, %v1408_v10  ;;  %1102 = vmatprep.subr.msk.bf16.mxu1 %vm132_vm0, %v1408_v10 }
  0x2f   :  { %328 = vmatpush1.bf16.msra.mxu0 %v1429_v13  ;;  %417 = vmatpush1.bf16.msra.mxu1 %v1429_v13 }
  0x30   :  { %495 = vmatprep.subr.bf16.mxu0 %v1347_v0  ;;  %1153 = vmatprep.subr.bf16.mxu1 %v1259_v18  ;;  %v1622_v0 = vrot.slane %v41_v61, %v53_v60 }
  0x32   :  { %1098 = vmatmul.mubr.msk.bf16.vlgmr.msra.gmra.mrb[8].mxu0 %vm125_vm1, %v1253_v19  ;;  %1103 = vmatmul.mubr.msk.bf16.vlgmr.msra.gmra.mrb[8].mxu1 %vm125_vm1, %v1254_v20 }
  0x33   :  { %496 = vmatpush1.bf16.msra.mxu0 %v1354_v2  ;;  %359 = vmatprep.mubr.bf16.mxu0 %v1299_v1 }
  0x34   :  { %497 = vmatprep.subr.bf16.mxu0 %v1361_v3  ;;  %448 = vmatprep.mubr.bf16.mxu1 %v1299_v1 }
  0x35   :  { %1154 = vmatpush3.bf16.msra.mxu1 %v1260_v21 }
  0x36   :  { %1155 = vmatprep.subr.bf16.mxu1 %v1261_v22 }
  0x37   :  { %498 = vmatpush1.bf16.msra.mxu0 %v1368_v4 }
  0x38   :  { %499 = vmatprep.subr.bf16.mxu0 %v1375_v5 }
  0x39   :  { %1156 = vmatpush3.bf16.msra.mxu1 %v1262_v23 }
  0x3a   :  { %1099 = vmatmul.mubr.msk.bf16.gmra.mrb[12].mxu0 %vm125_vm1, %v1255_v24  ;;  %1104 = vmatmul.mubr.msk.bf16.gmra.mrb[12].mxu1 %vm125_vm1, %v1256_v25 }
  0x3b   :  { %500 = vmatpush1.bf16.msra.mxu0 %v1382_v6  ;;  %527 = vmatprep.mubr.bf16.mxu0 %v1299_v1 }
  0x3c   :  { %501 = vmatprep.subr.bf16.mxu0 %v1389_v7  ;;  %1157 = vmatprep.subr.bf16.mxu1 %v1263_v26 }
  0x3d   :  { %1158 = vmatpush3.bf16.msra.mxu1 %v1264_v29 }
  0x3e   :  { %1159 = vmatprep.subr.bf16.mxu1 %v1265_v30 }
  0x3f   :  { %502 = vmatpush1.bf16.msra.mxu0 %v1396_v8 }
  0x40   :  { %503 = vmatprep.subr.bf16.mxu0 %v1403_v9 }
  0x41   :  { %1160 = vmatpush3.bf16.msra.mxu1 %v1266_v31 }
  0x42   :  { %1161 = vmatprep.subr.bf16.mxu1 %v1267_v32 }
  0x43   :  { %504 = vmatpush1.bf16.msra.mxu0 %v1418_v12 }
  0x44   :  { %1107 = vmatprep.subr.msk.bf16.mxu0 %vm132_vm0, %v1408_v10 }
  0x45   :  { %1162 = vmatpush3.bf16.msra.mxu1 %v1268_v33 }
  0x46   :  { %1163 = vmatprep.subr.bf16.mxu1 %v1269_v34 }
  0x47   :  { %506 = vmatpush1.bf16.msra.mxu0 %v1429_v13 }
  0x48   :  { %1175 = vmatprep.subr.bf16.mxu0 %v1272_v37 }
  0x49   :  { %1164 = vmatpush3.bf16.msra.mxu1 %v1270_v35 }
  0x4a   :  { %1108 = vmatmul.mubr.msk.bf16.vlgmr.msra.gmra.mrb[16].mxu0 %vm125_vm1, %v1257_v27  ;;  %1165 = vmatprep.subr.bf16.mxu1 %v1271_v36 }
  0x4b   :  { %537 = vmatprep.mubr.bf16.mxu0 %v1299_v1  ;;  %1176 = vmatpush3.bf16.msra.mxu0 %v1274_v39 }
  0x4c   :  { %1177 = vmatprep.subr.bf16.mxu0 %v1276_v41 }
  0x4d   :  { %1166 = vmatpush3.bf16.msra.mxu1 %v1273_v38 }
  0x4e   :  { %1167 = vmatprep.subr.bf16.mxu1 %v1275_v40 }
  0x4f   :  { %1178 = vmatpush3.bf16.msra.mxu0 %v1278_v43 }
  0x50   :  { %1179 = vmatprep.subr.bf16.mxu0 %v1279_v44 }
  0x51   :  { %1168 = vmatpush3.bf16.msra.mxu1 %v1277_v42 }
  0x52   :  { %1109 = vmatmul.mubr.msk.bf16.gmra.mrb[20].mxu0 %vm125_vm1, %v1258_v28  ;;  %1206 = vmatprep.subr.bf16.mxu1 %v1300_v53 }
  0x53   :  { %1180 = vmatpush3.bf16.msra.mxu0 %v1280_v45 }
  0x54   :  { %1181 = vmatprep.subr.bf16.mxu0 %v1281_v46 }
  0x57   :  { %1182 = vmatpush3.bf16.msra.mxu0 %v1282_v47 }
  0x58   :  { %1183 = vmatprep.subr.bf16.mxu0 %v1283_v48 }
  0x5b   :  { %1184 = vmatpush3.bf16.msra.mxu0 %v1284_v49 }
  0x5c   :  { %1185 = vmatprep.subr.bf16.mxu0 %v1285_v50 }
  0x5f   :  { %1186 = vmatpush3.bf16.msra.mxu0 %v1286_v51 }
  0x60   :  { %1187 = vmatprep.subr.bf16.mxu0 %v1287_v52 }
  0x63   :  { %1188 = vmatpush3.bf16.msra.mxu0 %v1289_v54 }
  0x64   :  { %1189 = vmatprep.subr.bf16.mxu0 %v1290_v55 }
  0x67   :  { %1190 = vmatpush3.bf16.msra.mxu0 %v1292_v56 }
  0xed   :  { %v173_v63 = vpop.f32.mrb[0].mxu0  ;;  %v262_v1 = vpop.f32.mrb[0].mxu1 }
  0xee   :  { %v175_v2 = vpop.f32.mrb[1].mxu0  ;;  %v264_v3 = vpop.f32.mrb[1].mxu1  ;;  %v174_v8 = vadd.f32 %v173_v63, %v1620_v62  ;;  %v263_v10 = vadd.f32 %v262_v1, %v1620_v62  ;;  %v1288_v1 = vld [vmem:[%s1713_s3 + $0x100] sm:$0xff]  }
  0xef   :  { %v177_v4 = vpop.f32.mrb[2].mxu0  ;;  %v266_v5 = vpop.f32.mrb[2].mxu1  ;;  %v176_v9 = vadd.f32 %v175_v2, %v1622_v0  ;;  %v265_v11 = vadd.f32 %v264_v3, %v1622_v0 }
  0xf0   :  { %v179_v6 = vpop.f32.mrb[3].mxu0  ;;  %v268_v7 = vpop.f32.mrb[3].mxu1  ;;  %v178_v12 = vadd.f32 %v177_v4, %v1620_v62  ;;  %v267_v13 = vadd.f32 %v266_v5, %v1620_v62  ;;  %v192_v16 = vmax.f32 %v174_v8, 0.0  ;;  %v281_v18 = vmax.f32 %v263_v10, 0.0  ;;  %v1291_v4 = vld [vmem:[%s1713_s3 + $0x108] sm:$0xff]  }
  0xf1   :  { %v180_v14 = vadd.f32 %v179_v6, %v1622_v0  ;;  %v269_v15 = vadd.f32 %v268_v7, %v1622_v0  ;;  %v193_v17 = vmax.f32 %v176_v9, 0.0  ;;  %v282_v19 = vmax.f32 %v265_v11, 0.0 }
  0xf2   :  { %v194_v22 = vmax.f32 %v178_v12, 0.0  ;;  %v283_v23 = vmax.f32 %v267_v13, 0.0 }
  0xf3   :  { %v195_v28 = vmax.f32 %v180_v14, 0.0  ;;  %v284_v29 = vmax.f32 %v269_v15, 0.0  ;;  %v1293_v15 = vld [vmem:[%s1713_s3 + $0x110] sm:$0xff]  }
  0xf5   :  { %v183_v20 = vpop.f32.mrb[4].mxu0  ;;  %v272_v21 = vpop.f32.mrb[4].mxu1 }
  0xf6   :  { %v184_v24 = vadd.f32 %v183_v20, %v1620_v62  ;;  %v273_v25 = vadd.f32 %v272_v21, %v1620_v62  ;;  %v185_v26 = vpop.f32.mrb[5].mxu0  ;;  %v274_v27 = vpop.f32.mrb[5].mxu1  ;;  %v1294_v20 = vld [vmem:[%s1713_s3 + $0x118] sm:$0xff]  }
  0xf7   :  { %v186_v30 = vadd.f32 %v185_v26, %v1622_v0  ;;  %v275_v31 = vadd.f32 %v274_v27, %v1622_v0  ;;  %v187_v32 = vpop.f32.mrb[6].mxu0  ;;  %v276_v33 = vpop.f32.mrb[6].mxu1 }
  0xf8   :  { %v196_v34 = vmax.f32 %v184_v24, 0.0  ;;  %v285_v35 = vmax.f32 %v273_v25, 0.0  ;;  %v188_v36 = vadd.f32 %v187_v32, %v1620_v62  ;;  %v277_v37 = vadd.f32 %v276_v33, %v1620_v62  ;;  %v189_v38 = vpop.f32.mrb[7].mxu0  ;;  %v278_v39 = vpop.f32.mrb[7].mxu1 }
  0xf9   :  { %v197_v40 = vmax.f32 %v186_v30, 0.0  ;;  %v286_v41 = vmax.f32 %v275_v31, 0.0  ;;  %v190_v42 = vadd.f32 %v189_v38, %v1622_v0  ;;  %v279_v43 = vadd.f32 %v278_v39, %v1622_v0 }
  0xfa   :  { %v200_v44 = vmax.f32 %v192_v16, %v196_v34  ;;  %v289_v45 = vmax.f32 %v281_v18, %v285_v35  ;;  %v198_v46 = vmax.f32 %v188_v36, 0.0  ;;  %v287_v47 = vmax.f32 %v277_v37, 0.0 }
  0xfb   :  { %v201_v48 = vmax.f32 %v193_v17, %v197_v40  ;;  %v290_v49 = vmax.f32 %v282_v19, %v286_v41  ;;  %v199_v50 = vmax.f32 %v190_v42, 0.0  ;;  %v288_v51 = vmax.f32 %v279_v43, 0.0 }
  0xfc   :  { %v202_v52 = vmax.f32 %v194_v22, %v198_v46  ;;  %v291_v54 = vmax.f32 %v283_v23, %v287_v47 }
  0xfd   :  { %v204_v55 = vmax.f32 %v200_v44, %v201_v48  ;;  %v293_v56 = vmax.f32 %v289_v45, %v290_v49  ;;  %v203_v57 = vmax.f32 %v195_v28, %v199_v50  ;;  %v292_v58 = vmax.f32 %v284_v29, %v288_v51  ;;  %v1295_v49 = vld [vmem:[%s1713_s3 + $0x120] sm:$0xff]  }
  0xff   :  { %v205_v59 = vmax.f32 %v202_v52, %v203_v57  ;;  %v294_v60 = vmax.f32 %v291_v54, %v292_v58 }
 0x101   :  { %v206_v61 = vpack.c.bf16 %v205_v59, %v204_v55  ;;  %v295_v63 = vpack.c.bf16 %v294_v60, %v293_v56 }
 0x103   :  { %928 = vmatprep.mubr.bf16.mxu1 %v295_v63 }
 0x104   :  { %929 = vmatmul.mubr.bf16.vlgmr.msra.gmra.mrb[16].mxu1 %v206_v61 }
 0x105   :  { %v351_v2 = vpop.f32.mrb[8].mxu0  ;;  %v440_v3 = vpop.f32.mrb[8].mxu1  ;;  %1207 = vmatpush3.bf16.msra.mxu1 %v1288_v1  ;;  %1222 = vmatprep.mubr.msk.bf16.mxu1 %vm1301_vm2, %v1300_v53 }
 0x106   :  { %v353_v5 = vpop.f32.mrb[9].mxu0  ;;  %v442_v6 = vpop.f32.mrb[9].mxu1  ;;  %1208 = vmatprep.subr.bf16.mxu1 %v1300_v53  ;;  %v352_v11 = vadd.f32 %v351_v2, %v1620_v62  ;;  %v441_v13 = vadd.f32 %v440_v3, %v1620_v62  ;;  %v1296_v3 = vld [vmem:[%s1713_s3 + $0x128] sm:$0xff]  }
 0x107   :  { %v355_v7 = vpop.f32.mrb[10].mxu0  ;;  %v444_v8 = vpop.f32.mrb[10].mxu1  ;;  %v354_v12 = vadd.f32 %v353_v5, %v1622_v0  ;;  %v443_v14 = vadd.f32 %v442_v6, %v1622_v0 }
 0x108   :  { %v357_v9 = vpop.f32.mrb[11].mxu0  ;;  %v446_v10 = vpop.f32.mrb[11].mxu1  ;;  %v356_v16 = vadd.f32 %v355_v7, %v1620_v62  ;;  %v445_v17 = vadd.f32 %v444_v8, %v1620_v62  ;;  %v370_v21 = vmax.f32 %v352_v11, 0.0  ;;  %v459_v23 = vmax.f32 %v441_v13, 0.0  ;;  %v1297_v8 = vld [vmem:[%s1713_s3 + $0x130] sm:$0xff]  }
 0x109   :  { %1209 = vmatpush3.bf16.msra.mxu1 %v1291_v4  ;;  %v358_v18 = vadd.f32 %v357_v9, %v1622_v0  ;;  %v447_v19 = vadd.f32 %v446_v10, %v1622_v0  ;;  %v371_v22 = vmax.f32 %v354_v12, 0.0  ;;  %v460_v24 = vmax.f32 %v443_v14, 0.0  ;;  %v1298_v10 = vld [vmem:[%s1713_s3 + $0x138] sm:$0xff]  }
 0x10a   :  { %1210 = vmatprep.subr.bf16.mxu1 %v1300_v53  ;;  %v372_v27 = vmax.f32 %v356_v16, 0.0  ;;  %v461_v28 = vmax.f32 %v445_v17, 0.0 }
 0x10b   :  { %v373_v33 = vmax.f32 %v358_v18, 0.0  ;;  %v462_v34 = vmax.f32 %v447_v19, 0.0 }
 0x10d   :  { %v361_v25 = vpop.f32.mrb[12].mxu0  ;;  %v450_v26 = vpop.f32.mrb[12].mxu1  ;;  %1211 = vmatpush3.bf16.msra.mxu1 %v1293_v15 }
 0x10e   :  { %v362_v29 = vadd.f32 %v361_v25, %v1620_v62  ;;  %v451_v30 = vadd.f32 %v450_v26, %v1620_v62  ;;  %v363_v31 = vpop.f32.mrb[13].mxu0  ;;  %v452_v32 = vpop.f32.mrb[13].mxu1  ;;  %1212 = vmatprep.subr.bf16.mxu1 %v1300_v53 }
 0x10f   :  { %v364_v35 = vadd.f32 %v363_v31, %v1622_v0  ;;  %v453_v36 = vadd.f32 %v452_v32, %v1622_v0  ;;  %v365_v37 = vpop.f32.mrb[14].mxu0  ;;  %v454_v38 = vpop.f32.mrb[14].mxu1 }
 0x110   :  { %v374_v39 = vmax.f32 %v362_v29, 0.0  ;;  %v463_v40 = vmax.f32 %v451_v30, 0.0  ;;  %v366_v41 = vadd.f32 %v365_v37, %v1620_v62  ;;  %v455_v42 = vadd.f32 %v454_v38, %v1620_v62  ;;  %v367_v43 = vpop.f32.mrb[15].mxu0  ;;  %v456_v44 = vpop.f32.mrb[15].mxu1 }
 0x111   :  { %v375_v45 = vmax.f32 %v364_v35, 0.0  ;;  %v464_v46 = vmax.f32 %v453_v36, 0.0  ;;  %v368_v47 = vadd.f32 %v367_v43, %v1622_v0  ;;  %v457_v48 = vadd.f32 %v456_v44, %v1622_v0  ;;  %1213 = vmatpush3.bf16.msra.mxu1 %v1294_v20 }
 0x112   :  { %v378_v50 = vmax.f32 %v370_v21, %v374_v39  ;;  %v467_v51 = vmax.f32 %v459_v23, %v463_v40  ;;  %v376_v52 = vmax.f32 %v366_v41, 0.0  ;;  %v465_v54 = vmax.f32 %v455_v42, 0.0  ;;  %1214 = vmatprep.subr.bf16.mxu1 %v1300_v53 }
 0x113   :  { %v379_v55 = vmax.f32 %v371_v22, %v375_v45  ;;  %v468_v56 = vmax.f32 %v460_v24, %v464_v46  ;;  %v377_v57 = vmax.f32 %v368_v47, 0.0  ;;  %v466_v58 = vmax.f32 %v457_v48, 0.0 }
 0x114   :  { %v380_v59 = vmax.f32 %v372_v27, %v376_v52  ;;  %v469_v60 = vmax.f32 %v461_v28, %v465_v54 }
 0x115   :  { %v382_v61 = vmax.f32 %v378_v50, %v379_v55  ;;  %v471_v63 = vmax.f32 %v467_v51, %v468_v56  ;;  %v381_v1 = vmax.f32 %v373_v33, %v377_v57  ;;  %v470_v2 = vmax.f32 %v462_v34, %v466_v58  ;;  %1215 = vmatpush3.bf16.msra.mxu1 %v1295_v49 }
 0x116   :  { %1216 = vmatprep.subr.bf16.mxu1 %v1300_v53 }
 0x117   :  { %v383_v4 = vmax.f32 %v380_v59, %v381_v1  ;;  %v472_v5 = vmax.f32 %v469_v60, %v470_v2 }
 0x119   :  { %v384_v6 = vpack.c.bf16 %v383_v4, %v382_v61  ;;  %v473_v7 = vpack.c.bf16 %v472_v5, %v471_v63  ;;  %1217 = vmatpush3.bf16.msra.mxu1 %v1296_v3  ;;  %v12_v3 = vstv %s1716_s6 }
 0x11a   :  { %1218 = vmatprep.subr.bf16.mxu1 %v1300_v53  ;;  %13 = vst [vmem:[#allocation3] sm:$0x1] %v12_v3 }
 0x11b   :  { %969 = vmatprep.mubr.bf16.mxu0 %v473_v7 }
 0x11c   :  { %970 = vmatmul.mubr.bf16.vlgmr.msra.gmra.mrb[24].mxu0 %v384_v6 }
 0x11d   :  { %v529_v9 = vpop.f32.mrb[16].mxu0  ;;  %1219 = vmatpush3.bf16.msra.mxu1 %v1297_v8  ;;  %v1151_v8 = vld [vmem:[%s1717_s5] ss:$0 sm:$0xff] }
 0x11e   :  { %v531_v11 = vpop.f32.mrb[17].mxu0  ;;  %1220 = vmatprep.subr.bf16.mxu1 %v1300_v53  ;;  %v530_v14 = vadd.f32 %v529_v9, %v1620_v62 }
 0x11f   :  { %v533_v12 = vpop.f32.mrb[18].mxu0  ;;  %v532_v15 = vadd.f32 %v531_v11, %v1622_v0 }
 0x120   :  { %v535_v13 = vpop.f32.mrb[19].mxu0  ;;  %v534_v17 = vadd.f32 %v533_v12, %v1620_v62  ;;  %v548_v23 = vmax.f32 %v530_v14, 0.0 }
 0x121   :  { %1221 = vmatpush3.bf16.msra.mxu1 %v1298_v10  ;;  %v536_v20 = vadd.f32 %v535_v13, %v1622_v0  ;;  %v549_v26 = vmax.f32 %v532_v15, 0.0 }
 0x122   :  { %v550_v29 = vmax.f32 %v534_v17, 0.0 }
 0x123   :  { %v551_v32 = vmax.f32 %v536_v20, 0.0 }
 0x125   :  { %v539_v16 = vpop.f32.mrb[20].mxu0 }
 0x126   :  { %v540_v18 = vadd.f32 %v539_v16, %v1620_v62  ;;  %v541_v19 = vpop.f32.mrb[21].mxu0  ;;  %v1152_v16 = vld [vmem:[#allocation3] ss:$0 sm:$0xff] }
 0x127   :  { %v542_v21 = vadd.f32 %v541_v19, %v1622_v0  ;;  %v543_v22 = vpop.f32.mrb[22].mxu0 }
 0x128   :  { %v552_v53 = vmax.f32 %v540_v18, 0.0  ;;  %v544_v24 = vadd.f32 %v543_v22, %v1620_v62  ;;  %v545_v25 = vpop.f32.mrb[23].mxu0 }
 0x129   :  { %v553_v27 = vmax.f32 %v542_v21, 0.0  ;;  %v546_v28 = vadd.f32 %v545_v25, %v1622_v0  ;;  %v1110_v0 = vld [vmem:[%s1715_s4] ss:$0 sm:$0xff] }
 0x12a   :  { %v556_v30 = vmax.f32 %v548_v23, %v552_v53  ;;  %v554_v31 = vmax.f32 %v544_v24, 0.0 }
 0x12b   :  { %v557_v33 = vmax.f32 %v549_v26, %v553_v27  ;;  %v555_v34 = vmax.f32 %v546_v28, 0.0 }
 0x12c   :  { %v558_v35 = vmax.f32 %v550_v29, %v554_v31 }
 0x12d   :  { %v560_v36 = vmax.f32 %v556_v30, %v557_v33  ;;  %v559_v37 = vmax.f32 %v551_v32, %v555_v34 }
 0x12f   :  { %v561_v38 = vmax.f32 %v558_v35, %v559_v37 }
 0x131   :  { %v562_v39 = vpack.c.bf16 %v561_v38, %v560_v36 }
 0x133   :  { %1223 = vmatmul.mubr.bf16.vlgmr.msra.gmra.mrb[20].mxu1 %v562_v39 }
 0x1d7   :  { %v1169_v40 = vpop.f32.mrb[16].mxu1 }
 0x1d8   :  { %v1170_v41 = vpop.f32.mrb[17].mxu1 }
 0x1d9   :  { %v1171_v62 = vadd.f32 %v1170_v41, %v1169_v40  ;;  %v1172_v42 = vpop.f32.mrb[18].mxu1 }
 0x1da   :  { %v1173_v43 = vpop.f32.mrb[19].mxu1 }
 0x1db   :  { %v1174_v44 = vadd.f32 %v1173_v43, %v1172_v42  ;;  %v931_v47 = vadd.f32 %v1171_v62, %v1110_v0 }
 0x1dd   :  { %v934_v51 = vadd.f32 %v1174_v44, %v1110_v0 }
 0x1ef   :  { %v1191_v45 = vpop.f32.mrb[24].mxu0 }
 0x1f0   :  { %v1192_v46 = vpop.f32.mrb[25].mxu0 }
 0x1f1   :  { %v1193_v48 = vadd.f32 %v1192_v46, %v1191_v45  ;;  %v1194_v49 = vpop.f32.mrb[26].mxu0 }
 0x1f2   :  { %v1195_v50 = vpop.f32.mrb[27].mxu0 }
 0x1f3   :  { %v1196_v52 = vadd.f32 %v1195_v50, %v1194_v49  ;;  %v972_v54 = vadd.f32 %v1193_v48, %v931_v47 }
 0x1f5   :  { %v975_v55 = vadd.f32 %v1196_v52, %v934_v51 }
 0x206   :  { %v1012_v56 = vpop.f32.mrb[20].mxu1 }
 0x207   :  { %v1013_v57 = vadd.f32 %v1012_v56, %v972_v54  ;;  %v1224_v58 = vpop.f32.mrb[21].mxu1 }
 0x208   :  { %v1015_v59 = vpop.f32.mrb[22].mxu1 }
 0x209   :  { %v1019_v60 = vmax.f32 %v1013_v57, 0.0  ;;  %v1016_v61 = vadd.f32 %v1015_v59, %v975_v55  ;;  %v1225_v63 = vpop.f32.mrb[23].mxu1 }
 0x20b   :  { %1023 = vrot.lane.b32.xlu0 %v1019_v60, %s1302_s27  ;;  %v1020_v1 = vmax.f32 %v1016_v61, 0.0 }
 0x20f   :  { %1025 = vrot.lane.b32.xlu0 %v1020_v1, %s1302_s27 }
 0x27d   :  { %v1024_v2 = vpop.permute.xlu0 %1023 }
 0x27e   :  { %v1029_v4 = vmax.f32 %v1019_v60, %v1024_v2 }
 0x280   :  { %1033 = vrot.lane.b32.xlu1 %v1029_v4, %s1303_s29 }
 0x281   :  { %v1026_v5 = vpop.permute.xlu0 %1025 }
 0x282   :  { %v1030_v6 = vmax.f32 %v1020_v1, %v1026_v5 }
 0x284   :  { %1035 = vrot.lane.b32.xlu1 %v1030_v6, %s1303_s29 }
 0x2f2   :  { %v1034_v7 = vpop.permute.xlu1 %1033 }
 0x2f3   :  { %v1039_v9 = vmax.f32 %v1029_v4, %v1034_v7 }
 0x2f5   :  { %v1048_v10 = vmul.f32 %v1151_v8, %v1039_v9 }
 0x2f6   :  { %v1036_v11 = vpop.permute.xlu1 %1035 }
 0x2f7   :  { %v1040_v12 = vmax.f32 %v1030_v6, %v1036_v11  ;;  %v1051_v13 = vsel %vm1050_vm3, %v1048_v10, 0.0 }
 0x2f8   :  { %1052 = vadd.xlane.f32.xlu0 %v1051_v13 }
 0x2f9   :  { %v1049_v14 = vmul.f32 %v1151_v8, %v1040_v12 }
 0x2fb   :  { %v1054_v15 = vsel %vm1050_vm3, %v1049_v14, 0.0 }
 0x2fc   :  { %1055 = vadd.xlane.f32.xlu1 %v1054_v15 }
 0x385   :  { %v1053_v17 = vpop.xlane.xlu0 %1052 }
 0x386   :  { %v1064_v18 = vadd.f32 %v1152_v16, %v1053_v17 }
 0x388   :  { %1067 = vst.msk [vmem:[%s1718_s7] sm:$0xff] %vm1066_vm4, %v1064_v18 }
 0x389   :  { %v1056_v19 = vpop.xlane.xlu1 %1055 }
 0x38a   :  { %v1065_v20 = vadd.f32 %v1152_v16, %v1056_v19 }
 0x38c   :  { %1068 = vst.msk [vmem:[%s1718_s7 + $0x8] sm:$0xff] %vm1066_vm4, %v1065_v20 }

</bundles_post_ra>
